<compile_context>
chip_gen: v6e
topology: v6e:2x2x1
jax: 0.10.0
libtpu: 0.0.40
codegen_flags: <defaults>
</compile_context>

<pallas_src>
import functools

import jax
import jax.numpy as jnp
import numpy as np
from jax.experimental import pallas as pl
from jax.experimental.pallas import tpu as pltpu


def rnn_chunk_kernel(x_ref, h0_ref, wih_ref, whh_ref, b_ref, wlin_ref, blin_ref,
                     out_ref, hn_ref, h_carry, xp_slab, h_slab,
                     *, t_chunk, batch):
    c = pl.program_id(0)

    # Initialize the carried hidden state from h0 on the first chunk.
    @pl.when(c == 0)
    def _():
        h_carry[...] = h0_ref[...].astype(jnp.float32)

    # --- Off the critical path: input projection for the whole chunk --------
    # (t_chunk*B, I) @ (I, H) + bias -> one MXU matmul per chunk. Bias folded
    # in here so the recurrence loop has no broadcasts at all.
    xp_slab[...] = (
        jnp.dot(x_ref[...], wih_ref[...], preferred_element_type=jnp.float32)
        + b_ref[...])

    whh = whh_ref[...]  # resident (H, H) recurrent weight, loaded once per chunk

    # --- Sequential recurrence over the chunk (unrolled for LLO scheduling) --
    def step(i, h_prev):
        rows = pl.ds(i * batch, batch)
        pre = xp_slab[rows, :] + jnp.dot(
            h_prev, whh, preferred_element_type=jnp.float32)
        h_new = jnp.tanh(pre)
        h_slab[rows, :] = h_new
        return h_new

    h_last = jax.lax.fori_loop(0, t_chunk, step, h_carry[...], unroll=True)
    h_carry[...] = h_last

    # --- Deferred output projection: one matmul + one contiguous block store -
    out_ref[...] = (
        jnp.dot(h_slab[...], wlin_ref[...], preferred_element_type=jnp.float32)
        + blin_ref[...]).astype(out_ref.dtype)

    # Final hidden state. Written every chunk (cheap: B x H) so the resident
    # output block is always initialized; the last writeback wins.
    hn_ref[...] = h_last.astype(hn_ref.dtype)


def standard_rnn_forward(x, h0, w_ih, w_hh, b_ih, b_hh, w_lin, b_lin,
                         *, t_chunk=4):
    """x: (S, B, I); h0: (1, B, H). Returns (output (S,B,O), hidden (1,B,H))."""
    S, B, I = x.shape
    H = w_ih.shape[0]
    O = w_lin.shape[0]
    assert S % t_chunk == 0, "seq_len must be divisible by t_chunk"
    rows = t_chunk * B

    # Flatten (seq, batch) -> rows so all in-kernel matmuls are 2-D.
    x2 = x.reshape(S * B, I)
    h0_2 = h0.reshape(B, H)
    wih_t = jnp.transpose(w_ih)          # (I, H)
    whh_t = jnp.transpose(w_hh)          # (H, H)
    wlin_t = jnp.transpose(w_lin)        # (H, O)
    b_comb = (b_ih + b_hh).reshape(1, H)
    blin2 = b_lin.reshape(1, O)

    kernel = functools.partial(rnn_chunk_kernel, t_chunk=t_chunk, batch=B)

    grid_spec = pltpu.PrefetchScalarGridSpec(
        num_scalar_prefetch=0,
        grid=(S // t_chunk,),
        in_specs=[
            pl.BlockSpec((rows, I), lambda c: (c, 0)),   # x chunk (flattened)
            pl.BlockSpec((B, H), lambda c: (0, 0)),      # h0
            pl.BlockSpec((I, H), lambda c: (0, 0)),      # W_ih^T (resident)
            pl.BlockSpec((H, H), lambda c: (0, 0)),      # W_hh^T (resident)
            pl.BlockSpec((1, H), lambda c: (0, 0)),      # b_ih + b_hh
            pl.BlockSpec((H, O), lambda c: (0, 0)),      # W_lin^T (resident)
            pl.BlockSpec((1, O), lambda c: (0, 0)),      # b_lin
        ],
        out_specs=[
            pl.BlockSpec((rows, O), lambda c: (c, 0)),   # output chunk
            pl.BlockSpec((B, H), lambda c: (0, 0)),      # final hidden
        ],
        scratch_shapes=[
            pltpu.VMEM((B, H), jnp.float32),       # h_carry across chunks
            pltpu.VMEM((rows, H), jnp.float32),    # xp_slab: chunk x-projection
            pltpu.VMEM((rows, H), jnp.float32),    # h_slab: chunk hidden states
        ],
    )

    out2, hn = pl.pallas_call(
        kernel,
        out_shape=(
            jax.ShapeDtypeStruct((S * B, O), x.dtype),
            jax.ShapeDtypeStruct((B, H), x.dtype),
        ),
        grid_spec=grid_spec,
        compiler_params=pltpu.CompilerParams(
            dimension_semantics=("arbitrary",)),   # time is sequential
    )(x2, h0_2, wih_t, whh_t, b_comb, wlin_t, blin2)

    return out2.reshape(S, B, O), hn.reshape(1, B, H)


def reference_forward(x, h0, w_ih, w_hh, b_ih, b_hh, w_lin, b_lin):
    """Pure-JAX reference (lax.scan) for validation."""
    def step(h, x_t):
        h_new = jnp.tanh(x_t @ w_ih.T + b_ih + h @ w_hh.T + b_hh)
        return h_new, h_new
    h_last, hs = jax.lax.scan(step, h0[0], x)
    out = hs @ w_lin.T + b_lin
    return out, h_last[None]


if __name__ == "__main__":
    # Small shapes consistent with the module's forward.
    S, B = 8, 2            # seq_len, batch
    I, H, O = 16, 32, 8    # input_size, hidden_size, output_size

    key = jax.random.PRNGKey(0)
    kx, kih, khh, kbi, kbh, kwl, kbl = jax.random.split(key, 7)

    # Deterministic parameter init mimicking PyTorch's U(-1/sqrt(H), 1/sqrt(H)).
    s = 1.0 / np.sqrt(H)
    w_ih = jax.random.uniform(kih, (H, I), jnp.float32, -s, s)
    w_hh = jax.random.uniform(khh, (H, H), jnp.float32, -s, s)
    b_ih = jax.random.uniform(kbi, (H,), jnp.float32, -s, s)
    b_hh = jax.random.uniform(kbh, (H,), jnp.float32, -s, s)
    w_lin = jax.random.uniform(kwl, (O, H), jnp.float32, -s, s)
    b_lin = jax.random.uniform(kbl, (O,), jnp.float32, -s, s)

    x = jax.random.normal(kx, (S, B, I), jnp.float32)
    h0 = jnp.zeros((1, B, H), jnp.float32)   # hidden_state=None -> zeros

    out, hn = standard_rnn_forward(x, h0, w_ih, w_hh, b_ih, b_hh,
                                   w_lin, b_lin, t_chunk=4)
    jax.block_until_ready((out, hn))

    ref_out, ref_hn = reference_forward(x, h0, w_ih, w_hh, b_ih, b_hh,
                                        w_lin, b_lin)
    np.testing.assert_allclose(np.asarray(out), np.asarray(ref_out),
                               rtol=1e-5, atol=1e-5)
    np.testing.assert_allclose(np.asarray(hn), np.asarray(ref_hn),
                               rtol=1e-5, atol=1e-5)

    print("KERNEL_OK")
</pallas_src>

<mosaic_0001>
module attributes {stable_mosaic.version = 11 : i64} {
  func.func @rnn_chunk_kernel(%arg0: i32, %arg1: memref<8x16xf32, #tpu.memory_space<vmem>>, %arg2: memref<2x32xf32, #tpu.memory_space<vmem>>, %arg3: memref<16x32xf32, #tpu.memory_space<vmem>>, %arg4: memref<32x32xf32, #tpu.memory_space<vmem>>, %arg5: memref<1x32xf32, #tpu.memory_space<vmem>>, %arg6: memref<32x8xf32, #tpu.memory_space<vmem>>, %arg7: memref<1x8xf32, #tpu.memory_space<vmem>>, %arg8: memref<8x8xf32, #tpu.memory_space<vmem>>, %arg9: memref<2x32xf32, #tpu.memory_space<vmem>>, %arg10: memref<2x32xf32, #tpu.memory_space<vmem>>, %arg11: memref<8x32xf32, #tpu.memory_space<vmem>>, %arg12: memref<8x32xf32, #tpu.memory_space<vmem>>) attributes {dimension_semantics = [#tpu.dimension_semantics<arbitrary>], iteration_bounds = array<i64: 2>, scalar_prefetch = 0 : i64, scratch_operands = 3 : i64, tpu.core_type = #tpu.core_type<tc>, window_params = [{transform_indices = @transform_0, window_bounds = array<i64: 8, 16>}, {pipeline_mode = #tpu.pipeline_mode<synchronous>, transform_indices = @transform_1, window_bounds = array<i64: 2, 32>}, {pipeline_mode = #tpu.pipeline_mode<synchronous>, transform_indices = @transform_2, window_bounds = array<i64: 16, 32>}, {pipeline_mode = #tpu.pipeline_mode<synchronous>, transform_indices = @transform_3, window_bounds = array<i64: 32, 32>}, {pipeline_mode = #tpu.pipeline_mode<synchronous>, transform_indices = @transform_4, window_bounds = array<i64: 1, 32>}, {pipeline_mode = #tpu.pipeline_mode<synchronous>, transform_indices = @transform_5, window_bounds = array<i64: 32, 8>}, {pipeline_mode = #tpu.pipeline_mode<synchronous>, transform_indices = @transform_6, window_bounds = array<i64: 1, 8>}, {transform_indices = @transform_7, window_bounds = array<i64: 8, 8>}, {pipeline_mode = #tpu.pipeline_mode<synchronous>, transform_indices = @transform_8, window_bounds = array<i64: 2, 32>}]} {
    %c0_i32 = arith.constant 0 : i32
    %0 = arith.cmpi eq, %arg0, %c0_i32 : i32
    %1 = arith.extui %0 : i1 to i32
    %c0_i32_0 = arith.constant 0 : i32
    %2 = arith.cmpi ne, %1, %c0_i32_0 : i32
    scf.if %2 {
      %c0_42 = arith.constant 0 : index
      %c0_43 = arith.constant 0 : index
      %53 = vector.load %arg2[%c0_42, %c0_43] : memref<2x32xf32, #tpu.memory_space<vmem>>, vector<2x32xf32>
      %c0_44 = arith.constant 0 : index
      %c0_45 = arith.constant 0 : index
      %54 = vector.load %arg10[%c0_44, %c0_45] : memref<2x32xf32, #tpu.memory_space<vmem>>, vector<2x32xf32>
      tpu.vector_store %arg10[%c0_44, %c0_45], %53 {strides = array<i32>} : memref<2x32xf32, #tpu.memory_space<vmem>>, vector<2x32xf32>,
    } else {
    }
    %c0 = arith.constant 0 : index
    %c0_1 = arith.constant 0 : index
    %3 = vector.load %arg1[%c0, %c0_1] : memref<8x16xf32, #tpu.memory_space<vmem>>, vector<8x16xf32>
    %c0_2 = arith.constant 0 : index
    %c0_3 = arith.constant 0 : index
    %4 = vector.load %arg3[%c0_2, %c0_3] : memref<16x32xf32, #tpu.memory_space<vmem>>, vector<16x32xf32>
    %cst = arith.constant dense<0.000000e+00> : vector<8x32xf32>
    %5 = tpu.matmul %3, %4, %cst {dimension_numbers = #tpu.dot_dimension_numbers<[1], [0], [0], [1], [0, 0, 1, 1], [], []>} : vector<8x16xf32>, vector<16x32xf32>, vector<8x32xf32> -> vector<8x32xf32>
    %c0_4 = arith.constant 0 : index
    %c0_5 = arith.constant 0 : index
    %6 = vector.load %arg5[%c0_4, %c0_5] : memref<1x32xf32, #tpu.memory_space<vmem>>, vector<1x32xf32>
    %7 = vector.broadcast %6 : vector<1x32xf32> to vector<8x32xf32>
    %8 = arith.addf %5, %7 : vector<8x32xf32>
    %c0_6 = arith.constant 0 : index
    %c0_7 = arith.constant 0 : index
    %9 = vector.load %arg11[%c0_6, %c0_7] : memref<8x32xf32, #tpu.memory_space<vmem>>, vector<8x32xf32>
    tpu.vector_store %arg11[%c0_6, %c0_7], %8 {strides = array<i32>} : memref<8x32xf32, #tpu.memory_space<vmem>>, vector<8x32xf32>,
    %c0_8 = arith.constant 0 : index
    %c0_9 = arith.constant 0 : index
    %10 = vector.load %arg4[%c0_8, %c0_9] : memref<32x32xf32, #tpu.memory_space<vmem>>, vector<32x32xf32>
    %c0_10 = arith.constant 0 : index
    %c0_11 = arith.constant 0 : index
    %11 = vector.load %arg10[%c0_10, %c0_11] : memref<2x32xf32, #tpu.memory_space<vmem>>, vector<2x32xf32>
    %c0_i32_12 = arith.constant 0 : i32
    %c2_i32 = arith.constant 2 : i32
    %12 = arith.muli %c0_i32_12, %c2_i32 : i32
    %13 = arith.index_cast %12 : i32 to index
    %c0_13 = arith.constant 0 : index
    %14 = vector.load %arg11[%13, %c0_13] : memref<8x32xf32, #tpu.memory_space<vmem>>, vector<2x32xf32>
    %cst_14 = arith.constant dense<0.000000e+00> : vector<2x32xf32>
    %15 = tpu.matmul %11, %10, %cst_14 {dimension_numbers = #tpu.dot_dimension_numbers<[1], [0], [0], [1], [0, 0, 1, 1], [], []>} : vector<2x32xf32>, vector<32x32xf32>, vector<2x32xf32> -> vector<2x32xf32>
    %16 = arith.addf %14, %15 : vector<2x32xf32>
    %17 = math.tanh %16 : vector<2x32xf32>
    %18 = arith.index_cast %12 : i32 to index
    %c0_15 = arith.constant 0 : index
    %19 = vector.load %arg12[%18, %c0_15] : memref<8x32xf32, #tpu.memory_space<vmem>>, vector<2x32xf32>
    tpu.vector_store %arg12[%18, %c0_15], %17 {strides = array<i32>} : memref<8x32xf32, #tpu.memory_space<vmem>>, vector<2x32xf32>,
    %c1_i32 = arith.constant 1 : i32
    %c2_i32_16 = arith.constant 2 : i32
    %20 = arith.muli %c1_i32, %c2_i32_16 : i32
    %21 = arith.index_cast %20 : i32 to index
    %c0_17 = arith.constant 0 : index
    %22 = vector.load %arg11[%21, %c0_17] : memref<8x32xf32, #tpu.memory_space<vmem>>, vector<2x32xf32>
    %cst_18 = arith.constant dense<0.000000e+00> : vector<2x32xf32>
    %23 = tpu.matmul %17, %10, %cst_18 {dimension_numbers = #tpu.dot_dimension_numbers<[1], [0], [0], [1], [0, 0, 1, 1], [], []>} : vector<2x32xf32>, vector<32x32xf32>, vector<2x32xf32> -> vector<2x32xf32>
    %24 = arith.addf %22, %23 : vector<2x32xf32>
    %25 = math.tanh %24 : vector<2x32xf32>
    %26 = arith.index_cast %20 : i32 to index
    %c0_19 = arith.constant 0 : index
    %27 = vector.load %arg12[%26, %c0_19] : memref<8x32xf32, #tpu.memory_space<vmem>>, vector<2x32xf32>
    tpu.vector_store %arg12[%26, %c0_19], %25 {strides = array<i32>} : memref<8x32xf32, #tpu.memory_space<vmem>>, vector<2x32xf32>,
    %c2_i32_20 = arith.constant 2 : i32
    %c2_i32_21 = arith.constant 2 : i32
    %28 = arith.muli %c2_i32_20, %c2_i32_21 : i32
    %29 = arith.index_cast %28 : i32 to index
    %c0_22 = arith.constant 0 : index
    %30 = vector.load %arg11[%29, %c0_22] : memref<8x32xf32, #tpu.memory_space<vmem>>, vector<2x32xf32>
    %cst_23 = arith.constant dense<0.000000e+00> : vector<2x32xf32>
    %31 = tpu.matmul %25, %10, %cst_23 {dimension_numbers = #tpu.dot_dimension_numbers<[1], [0], [0], [1], [0, 0, 1, 1], [], []>} : vector<2x32xf32>, vector<32x32xf32>, vector<2x32xf32> -> vector<2x32xf32>
    %32 = arith.addf %30, %31 : vector<2x32xf32>
    %33 = math.tanh %32 : vector<2x32xf32>
    %34 = arith.index_cast %28 : i32 to index
    %c0_24 = arith.constant 0 : index
    %35 = vector.load %arg12[%34, %c0_24] : memref<8x32xf32, #tpu.memory_space<vmem>>, vector<2x32xf32>
    tpu.vector_store %arg12[%34, %c0_24], %33 {strides = array<i32>} : memref<8x32xf32, #tpu.memory_space<vmem>>, vector<2x32xf32>,
    %c3_i32 = arith.constant 3 : i32
    %c2_i32_25 = arith.constant 2 : i32
    %36 = arith.muli %c3_i32, %c2_i32_25 : i32
    %37 = arith.index_cast %36 : i32 to index
    %c0_26 = arith.constant 0 : index
    %38 = vector.load %arg11[%37, %c0_26] : memref<8x32xf32, #tpu.memory_space<vmem>>, vector<2x32xf32>
    %cst_27 = arith.constant dense<0.000000e+00> : vector<2x32xf32>
    %39 = tpu.matmul %33, %10, %cst_27 {dimension_numbers = #tpu.dot_dimension_numbers<[1], [0], [0], [1], [0, 0, 1, 1], [], []>} : vector<2x32xf32>, vector<32x32xf32>, vector<2x32xf32> -> vector<2x32xf32>
    %40 = arith.addf %38, %39 : vector<2x32xf32>
    %41 = math.tanh %40 : vector<2x32xf32>
    %42 = arith.index_cast %36 : i32 to index
    %c0_28 = arith.constant 0 : index
    %43 = vector.load %arg12[%42, %c0_28] : memref<8x32xf32, #tpu.memory_space<vmem>>, vector<2x32xf32>
    tpu.vector_store %arg12[%42, %c0_28], %41 {strides = array<i32>} : memref<8x32xf32, #tpu.memory_space<vmem>>, vector<2x32xf32>,
    %c4_i32 = arith.constant 4 : i32
    %c0_29 = arith.constant 0 : index
    %c0_30 = arith.constant 0 : index
    %44 = vector.load %arg10[%c0_29, %c0_30] : memref<2x32xf32, #tpu.memory_space<vmem>>, vector<2x32xf32>
    tpu.vector_store %arg10[%c0_29, %c0_30], %41 {strides = array<i32>} : memref<2x32xf32, #tpu.memory_space<vmem>>, vector<2x32xf32>,
    %c0_31 = arith.constant 0 : index
    %c0_32 = arith.constant 0 : index
    %45 = vector.load %arg12[%c0_31, %c0_32] : memref<8x32xf32, #tpu.memory_space<vmem>>, vector<8x32xf32>
    %c0_33 = arith.constant 0 : index
    %c0_34 = arith.constant 0 : index
    %46 = vector.load %arg6[%c0_33, %c0_34] : memref<32x8xf32, #tpu.memory_space<vmem>>, vector<32x8xf32>
    %cst_35 = arith.constant dense<0.000000e+00> : vector<8x8xf32>
    %47 = tpu.matmul %45, %46, %cst_35 {dimension_numbers = #tpu.dot_dimension_numbers<[1], [0], [0], [1], [0, 0, 1, 1], [], []>} : vector<8x32xf32>, vector<32x8xf32>, vector<8x8xf32> -> vector<8x8xf32>
    %c0_36 = arith.constant 0 : index
    %c0_37 = arith.constant 0 : index
    %48 = vector.load %arg7[%c0_36, %c0_37] : memref<1x8xf32, #tpu.memory_space<vmem>>, vector<1x8xf32>
    %49 = vector.broadcast %48 : vector<1x8xf32> to vector<8x8xf32>
    %50 = arith.addf %47, %49 : vector<8x8xf32>
    %c0_38 = arith.constant 0 : index
    %c0_39 = arith.constant 0 : index
    %51 = vector.load %arg8[%c0_38, %c0_39] : memref<8x8xf32, #tpu.memory_space<vmem>>, vector<8x8xf32>
    tpu.vector_store %arg8[%c0_38, %c0_39], %50 {strides = array<i32>} : memref<8x8xf32, #tpu.memory_space<vmem>>, vector<8x8xf32>,
    %c0_40 = arith.constant 0 : index
    %c0_41 = arith.constant 0 : index
    %52 = vector.load %arg9[%c0_40, %c0_41] : memref<2x32xf32, #tpu.memory_space<vmem>>, vector<2x32xf32>
    tpu.vector_store %arg9[%c0_40, %c0_41], %41 {strides = array<i32>} : memref<2x32xf32, #tpu.memory_space<vmem>>, vector<2x32xf32>,
    return
  }
  func.func @transform_0(%arg0: i32) -> (i32, i32) {
    %c0_i32 = arith.constant 0 : i32
    %c0_i32_0 = arith.constant 0 : i32
    return %arg0, %c0_i32 : i32, i32
  }
  func.func @transform_1(%arg0: i32) -> (i32, i32) {
    %c0_i32 = arith.constant 0 : i32
    %c0_i32_0 = arith.constant 0 : i32
    %c0_i32_1 = arith.constant 0 : i32
    return %c0_i32, %c0_i32_0 : i32, i32
  }
  func.func @transform_2(%arg0: i32) -> (i32, i32) {
    %c0_i32 = arith.constant 0 : i32
    %c0_i32_0 = arith.constant 0 : i32
    %c0_i32_1 = arith.constant 0 : i32
    return %c0_i32, %c0_i32_0 : i32, i32
  }
  func.func @transform_3(%arg0: i32) -> (i32, i32) {
    %c0_i32 = arith.constant 0 : i32
    %c0_i32_0 = arith.constant 0 : i32
    %c0_i32_1 = arith.constant 0 : i32
    return %c0_i32, %c0_i32_0 : i32, i32
  }
  func.func @transform_4(%arg0: i32) -> (i32, i32) {
    %c0_i32 = arith.constant 0 : i32
    %c0_i32_0 = arith.constant 0 : i32
    %c0_i32_1 = arith.constant 0 : i32
    return %c0_i32, %c0_i32_0 : i32, i32
  }
  func.func @transform_5(%arg0: i32) -> (i32, i32) {
    %c0_i32 = arith.constant 0 : i32
    %c0_i32_0 = arith.constant 0 : i32
    %c0_i32_1 = arith.constant 0 : i32
    return %c0_i32, %c0_i32_0 : i32, i32
  }
  func.func @transform_6(%arg0: i32) -> (i32, i32) {
    %c0_i32 = arith.constant 0 : i32
    %c0_i32_0 = arith.constant 0 : i32
    %c0_i32_1 = arith.constant 0 : i32
    return %c0_i32, %c0_i32_0 : i32, i32
  }
  func.func @transform_7(%arg0: i32) -> (i32, i32) {
    %c0_i32 = arith.constant 0 : i32
    %c0_i32_0 = arith.constant 0 : i32
    return %arg0, %c0_i32 : i32, i32
  }
  func.func @transform_8(%arg0: i32) -> (i32, i32) {
    %c0_i32 = arith.constant 0 : i32
    %c0_i32_0 = arith.constant 0 : i32
    %c0_i32_1 = arith.constant 0 : i32
    return %c0_i32, %c0_i32_0 : i32, i32
  }
}

</mosaic_0001>

<bundles_post_ra>
// kernel: tpu_custom_call.1
= control target key start
LH: loop header
LB: loop body
LE: loop exit
PB: predicated region body
PF: predicated region fallthrough
CT: control target
= control target key end

     0   :  { %14 = vsyncpa [#allocation6], 0  ;;  %s1500_s0 = inlined_call_operand.hbm [shape: f32[16,16], index: 0, kind: input, shape index: {}]   ;;  %s1501_s1 = inlined_call_operand.vmem [shape: f32[2,32], index: 1, kind: input, shape index: {}]   ;;  %s1502_s2 = inlined_call_operand.hbm [shape: f32[16,32], index: 2, kind: input, shape index: {}]   ;;  %s1503_s3 = inlined_call_operand.vmem [shape: f32[32,32], index: 3, kind: input, shape index: {}]   ;;  %s1504_s4 = inlined_call_operand.vmem [shape: f32[1,32], index: 4, kind: input, shape index: {}]   ;;  %s1505_s5 = inlined_call_operand.vmem [shape: f32[32,8], index: 5, kind: input, shape index: {}]   ;;  %s1506_s6 = inlined_call_operand.vmem [shape: f32[1,8], index: 6, kind: input, shape index: {}]   ;;  %s1507_s7 = inlined_call_operand.vmem [shape: f32[16,8], index: 7, kind: output, shape index: {0}]   ;;  %s1508_s8 = inlined_call_operand.hbm [shape: f32[2,32], index: 8, kind: output, shape index: {1}]  }
   0x1   :  { %16 = vsyncpa [#allocation6 + $0x1], 0 }
   0x2   :  { %17 = vsyncpa [#allocation9], 0 }
   0x3   :  { %18 = vsyncpa [#allocation7], 0  ;;  %s1286_s27 = smov 0   ;;  %s1288_s28 = smov 0  }
   0x4   :  { %s1290_s29 = smov 0   ;;  %s1292_s30 = smov 0  }
   0x5 LB: > { %s1305_s9 = sadd.s32 4294967295, %s1232_s30   ;;  %p44_p0 = scmp.ne.s32.totalorder %s1224_s28, %s1220_s27  ;;  %s1232_s30 = sphi %s1292_s30, %s1524_s30   ;;  %s1228_s29 = sphi %s1290_s29, %s1523_s29   ;;  %s1224_s28 = sphi %s1288_s28, %s1522_s28   ;;  %s1220_s27 = sphi %s1286_s27, %s1521_s27  }
   0x6   : > { %p1509_p1 = scmp.eq.s32.totalorder %s1305_s9, 0  ;;  %p931_p2 = scmp.ge.s32.totalorder %s1232_s30, 1 }
   0x7   : > { %p228_p3 = scmp.lt.s32.totalorder %s1232_s30, 3  ;;  %s1234_s12 = smov [#allocation8]  }
   0x8   : > { %p1314_p5 = por %p1509_p1, %p44_p0  ;;  %s243_s13 = sshll.u32 %s1234_s12, 4  ;;  %s244_s13 = int_to_ptr.vmem [resolvable:$true] %s243_s13 }
   0x9   : > { %p1318_p6 = pnand %p931_p2, %p228_p3  ;;  %s1331_s15 = sadd.s32 1, %s1232_s30  }
   0xa   : > { %s1512_s10 = scalar_select %p1314_p5, 1, 0 }
   0xb   : > { %s1513_s11 = scalar_select %p1318_p6, 1, 0 }
   0xc   : > { %p1053_p7 = pneg %p1318_p6  ;;  %s31_s16 = sadd.s32 1, %s1228_s29 }
   0xd   : > { %s28_s17 = ssub.s32 %s1232_s30, %s1331_s15  ;;  %s1123_s18 = scalar_lea.vmem %s244_s13, 256 }
   0xe   : > { %p1326_p8 = pnand %p1053_p7, %p1509_p1  ;;  %p1124_p10 = scmp.ne.s32.totalorder %s244_s13, %s1123_s18 }
   0xf   : > { %p1131_p13 = scmp.lt.s32.totalorder %s244_s13, %s244_s13  ;;  %p1132_p0 = scmp.lt.s32.totalorder %s1123_s18, %s1123_s18 }
  0x10   : > { %p1114_p9 = pneg %p1326_p8 }
  0x11   : > { %p1133_p2 = por %p1132_p0, %p1131_p13 }
  0x12   : > { %p1126_p11 = pnand %p1124_p10, %p1114_p9 }
  0x14   : > { %p1127_p12 = pneg %p1126_p11 }
  0x16   : > { %p1134_p3 = pnand %p1133_p2, %p1127_p12 }
  0x18   : > { %1137 = shalt.err (!%p1134_p3)
}
  0x19   : > { %s1235_s19 = smov 128   ;;  %s1236_s20 = smov 8  }
  0x1a   : > { %1056 = dma.hbm_to_vmem [thread:$0]  (!%p1326_p8), %s1502_s2, 256, %s244_s13, [#allocation9], %s1235_s19, %s1235_s19, %s1236_s20  }
  0x1b   : > { %p29_p7 = scmp.eq.s32.totalorder %s28_s17, 0  ;;  %p38_p9 = scmp.ne.s32.totalorder %s1228_s29, %s1224_s28 }
  0x1c   : > { %p39_p10 = scmp.eq.s32.totalorder %s1232_s30, 0  ;;  %p1062_p11 = scmp.lt.s32.totalorder %s1232_s30, 2 }
  0x1d   : > { %s1348_s23 = scalar_select %p29_p7, %s1228_s29, %s31_s16  }
  0x1e   : > { %p40_p12 = por %p39_p10, %p38_p9  ;;  %s269_s24 = sand.u32 1, %s1228_s29  }
  0x1f   : > { %s934_s25 = sshll.u32 %s269_s24, 3  ;;  %s935_s26 = sshll.u32 %s1232_s30, 7 }
  0x20   : > { %s1355_s18 = scalar_lea.hbm %s1500_s0, %s935_s26  ;;  %s273_s14 = scalar_lea.vmem [#allocation5], %s934_s25 }
  0x21   : > { %s280_s13 = sshll.u32 %s273_s14, 4  ;;  %p1357_p8 = pnand %p1062_p11, %p40_p12  ;;  %s281_s13 = int_to_ptr.vmem [resolvable:$true] %s280_s13 }
  0x22   : > { %s270_s16 = scalar_lea.sflag [#allocation6], %s269_s24  ;;  %s1138_s19 = scalar_lea.hbm %s1355_s18, 128 }
  0x23   : > { %p1139_p13 = scmp.ne.s32.totalorder %s1355_s18, %s1138_s19  ;;  %p1140_p0 = pneg %p1357_p8 }
  0x24   : > { %s1143_s21 = scalar_lea.hbm %s1500_s0, 256  ;;  %p1144_p7 = scmp.lt.s32.totalorder %s1355_s18, %s1500_s0 }
  0x25   : > { %p1141_p2 = pnand %p1140_p0, %p1139_p13  ;;  %p1145_p9 = scmp.lt.s32.totalorder %s1143_s21, %s1138_s19 }
  0x27   : > { %p1142_p3 = pneg %p1141_p2  ;;  %p1146_p10 = por %p1145_p9, %p1144_p7 }
  0x29   : > { %p1147_p11 = pnand %p1146_p10, %p1142_p3 }
  0x2b   : > { %1150 = shalt.err (!%p1147_p11)
}
  0x2c   : > { %s1151_s26 = scalar_lea.vmem %s281_s13, 128  ;;  %s1237_s24 = smov [#allocation5]  }
  0x2d   : > { %p1152_p12 = scmp.ne.s32.totalorder %s281_s13, %s1151_s26  ;;  %s1156_s27 = sshll.u32 %s1237_s24, 4  ;;  %s1157_s27 = int_to_ptr.vmem [resolvable:$false] %s1156_s27 }
  0x2e   : > { %s1158_s12 = scalar_lea.vmem %s1157_s27, 256  ;;  %p1159_p13 = scmp.lt.s32.totalorder %s281_s13, %s1157_s27 }
  0x2f   : > { %p1154_p4 = pnand %p1152_p12, %p1140_p0  ;;  %p1160_p2 = scmp.lt.s32.totalorder %s1158_s12, %s1151_s26 }
  0x31   : > { %p1155_p1 = pneg %p1154_p4  ;;  %p1161_p5 = por %p1160_p2, %p1159_p13 }
  0x33   : > { %p1162_p6 = pnand %p1161_p5, %p1155_p1 }
  0x35   : > { %1165 = shalt.err (!%p1162_p6)
}
  0x36   : > { %1060 = dma.hbm_to_vmem [thread:$0]  (!%p1357_p8), %s1355_s18, 128, %s281_s13, %s270_s16  }
  0x37   : > { %p1516_p3 = scmp.ne.s32.totalorder %s1513_s11, 0 }
  0x38   : > { %s291_s14 = sand.u32 (!%p1516_p3), 1, %s1224_s28   ;;  %p1517_p4 = scmp.ne.s32.totalorder (!%p1516_p3), %s1512_s10, 0 }
  0x39   : > { %289 = sbr.rel (%p1516_p3) target bundleno = 1133 (0x46d), region = 48  ;;  %s937_s19 = sshll.u32 (!%p1516_p3), %s291_s14, 3 }
  0x3a   : > { %s292_s30 = scalar_lea.sflag (!%p1516_p3), [#allocation6], %s291_s14  ;;  %s295_s20 = scalar_lea.vmem (!%p1516_p3), [#allocation5], %s937_s19 }
  0x3e   : > { %1207 = dma.done.wait (%p1517_p4), %s292_s30, 128  }
  0x3f   : > { %1209 = vsyncadd (%p1517_p4), %s292_s30, 4294967168  ;;  %p1518_p1 = scmp.eq.s32.totalorder %s1305_s9, 0 }
  0x41   : > { %1211 = dma.done.wait (%p1518_p1), [#allocation9], 256   ;;  %p1519_p5 = pmov %p1518_p1 }
  0x42   : > { %p331_p6 = scmp.lt.s32.totalorder %s1305_s9, 1  ;;  %p1520_p8 = scmp.ne.s32.totalorder %s1305_s9, 0 }
  0x43   : > { %1213 = vsyncadd (%p1519_p5), [#allocation9], 4294967040 }
  0x44   : > { %s332_s11 = scalar_select %p331_p6, %s1305_s9, 1 }
  0x45   : > { %338 = sbr.rel (%p1520_p8) target bundleno = 76 (0x4c), region = 60 }
  0x46   : > { %s939_s18 = sshll.u32 %s332_s11, 3 }
  0x47   : > { %s1391_s16 = scalar_lea.vmem %s1507_s7, %s939_s18 }
  0x4a   : > { %v339_v0 = vld [vmem:[%s1501_s1] sm:$0x3]  ;;  %vm340_vm0 = vcmask 254976  }
  0x4b   : > { %341 = vst.msk [vmem:[#allocation2] sm:$0x3] %vm340_vm0, %v339_v0 }
  0x4c PF: > { %v344_v1 = vld [vmem:[#allocation8 + $0x8] sm:$0xff]  ;;  %v1238_v2 = vmov 0.0   ;;  %v343_v3 = vld [vmem:[#allocation8] sm:$0xff]  ;;  %vm1239_vm1 = vmmov 0   ;;  %v431_v4 = vld [vmem:[%s1503_s3 + $0x18] sm:$0xff]  ;;  %vm352_vm2 = vcmask 130048  }
  0x4d   : > { %981 = vmatprep.subr.mxu0 %v1238_v2  ;;  %985 = vmatprep.mubr.msk.f32.mxu0 %vm1239_vm1, %v1238_v2  ;;  %v342_v5 = vld [vmem:[%s295_s20] sm:$0xff]  ;;  %v429_v7 = vld [vmem:[%s1503_s3 + $0x8] sm:$0xff]  ;;  %vm426_vm3 = vcmask 261120   ;;  %vm509_vm4 = vcmask 254976   ;;  %p1064_p0 = scmp.eq.s32.totalorder %s1305_s9, 1  ;;  %s1240_s26 = smov [#allocation10]  }
  0x4e   : > { %982 = vmatpush3.msra.mxu0 %v344_v1  ;;  %988 = vmatprep.subr.mxu1 %v1238_v2  ;;  %v430_v6 = vld [vmem:[%s1503_s3 + $0x10] sm:$0xff]  ;;  %v428_v8 = vld [vmem:[%s1503_s3] sm:$0xff]  ;;  %v747_v29 = vld [vmem:[%s1505_s5 + $0x18] sm:$0xff]  ;;  %s845_s24 = sshll.u32 %s1240_s26, 4  ;;  %s846_s24 = int_to_ptr.vmem [resolvable:$true] %s845_s24 }
  0x4f   : > { %983 = vmatprep.subr.mxu0 %v1238_v2  ;;  %989 = vmatpush3.msra.mxu1 %v431_v4  ;;  %v941_v10 = vld [vmem:[%s1504_s4] ss:$0 sm:$0xff]  ;;  %v746_v30 = vld [vmem:[%s1505_s5 + $0x10] sm:$0xff]  ;;  %v745_v31 = vld [vmem:[%s1505_s5 + $0x8] sm:$0xff]  ;;  %s1166_s27 = scalar_lea.vmem %s846_s24, 32  ;;  %p1173_p11 = scmp.lt.s32.totalorder %s846_s24, %s846_s24 }
  0x50   : > { %984 = vmatpush3.msra.mxu0 %v343_v3  ;;  %990 = vmatprep.subr.mxu1 %v1238_v2  ;;  %v744_v32 = vld [vmem:[%s1505_s5] sm:$0xff]  ;;  %p1167_p7 = scmp.ne.s32.totalorder %s846_s24, %s1166_s27  ;;  %p1174_p12 = scmp.lt.s32.totalorder %s1166_s27, %s1166_s27 }
  0x51   : > { %986 = vmatmul.mubr.msk.f32.vlgmr.msra.gmra.mxu0 %vm352_vm2, %v342_v5  ;;  %991 = vmatpush3.msra.mxu1 %v430_v6 }
  0x52   : > { %992 = vmatprep.subr.mxu1 %v1238_v2  ;;  %996 = vmatprep.mubr.msk.f32.mxu1 %vm1239_vm1, %v1238_v2  ;;  %v432_v9 = vld [vmem:[#allocation2] sm:$0x3]  ;;  %p1168_p9 = pnand %p1167_p7, %p1064_p0  ;;  %p1175_p13 = por %p1174_p12, %p1173_p11 }
  0x53   : > { %993 = vmatpush3.msra.mxu1 %v429_v7  ;;  %999 = vmatprep.subr.mxu0 %v1238_v2 }
  0x54   : > { %994 = vmatprep.subr.mxu1 %v1238_v2  ;;  %1000 = vmatpush3.msra.mxu0 %v431_v4  ;;  %p1169_p10 = pneg %p1168_p9 }
  0x55   : > { %995 = vmatpush3.msra.mxu1 %v428_v8  ;;  %1001 = vmatprep.subr.mxu0 %v1238_v2 }
  0x56   : > { %997 = vmatmul.mubr.msk.f32.vlgmr.msra.gmra.mxu1 %vm426_vm3, %v432_v9  ;;  %1002 = vmatpush3.msra.mxu0 %v430_v6  ;;  %p1176_p2 = pnand %p1175_p13, %p1169_p10 }
  0x57   : > { %1003 = vmatprep.subr.mxu0 %v1238_v2  ;;  %1007 = vmatprep.mubr.msk.f32.mxu0 %vm1239_vm1, %v1238_v2 }
  0x58   : > { %1004 = vmatpush3.msra.mxu0 %v429_v7  ;;  %1010 = vmatprep.subr.mxu1 %v1238_v2 }
  0x59   : > { %1005 = vmatprep.subr.mxu0 %v1238_v2  ;;  %1011 = vmatpush3.msra.mxu1 %v431_v4 }
  0x5a   : > { %1006 = vmatpush3.msra.mxu0 %v428_v8  ;;  %1012 = vmatprep.subr.mxu1 %v1238_v2 }
  0x5b   : > { %1013 = vmatpush3.msra.mxu1 %v430_v6  ;;  %1018 = vmatprep.mubr.msk.f32.mxu1 %vm1239_vm1, %v1238_v2 }
  0x5c   : > { %1014 = vmatprep.subr.mxu1 %v1238_v2  ;;  %1021 = vmatprep.subr.mxu0 %v1238_v2 }
  0x5d   : > { %1015 = vmatpush3.msra.mxu1 %v429_v7 }
  0x5e   : > { %1016 = vmatprep.subr.mxu1 %v1238_v2 }
  0x5f   : > { %1017 = vmatpush3.msra.mxu1 %v428_v8 }
  0x60   : > { %1032 = vmatprep.subr.mxu1 %v1238_v2 }
 0x111   : > { %v422_v11 = vpop.f32.mrf.mxu0 }
 0x112   : > { %v423_v12 = vadd.f32 %v941_v10, %v422_v11 }
 0x113   : > { %v987_v13 = vpop.f32.mrf.mxu0 }
 0x114   : > { %427 = vst.msk [vmem:[#allocation3] sm:$0xff] %vm426_vm3, %v423_v12 }
 0x116   : > { %v503_v14 = vpop.f32.mrf.mxu1 }
 0x118   : > { %v998_v15 = vpop.f32.mrf.mxu1 }
 0x11b   : > { %v433_v16 = vld [vmem:[#allocation3] sm:$0x3]  ;;  %v511_v19 = vld [vmem:[#allocation3 + $0x2] sm:$0x3]  ;;  %v588_v24 = vld [vmem:[#allocation3 + $0x4] sm:$0x3] }
 0x11c   : > { %v507_v17 = vadd.f32 %v503_v14, %v433_v16  ;;  %v665_v33 = vld [vmem:[#allocation3 + $0x6] sm:$0x3] }
 0x11e   : > { %1104 = vtanh.f32 %v507_v17 }
 0x12b   : > { %v1105_v18 = vpop.eup %1104 }
 0x12c   : > { %510 = vst.msk [vmem:[#allocation4] sm:$0x3] %vm509_vm4, %v1105_v18  ;;  %1008 = vmatmul.mubr.msk.f32.vlgmr.msra.gmra.mxu0 %vm426_vm3, %v1105_v18 }
 0x12d   : > { %1022 = vmatpush3.msra.mxu0 %v431_v4  ;;  %1029 = vmatprep.mubr.msk.f32.mxu0 %vm1239_vm1, %v1238_v2 }
 0x12e   : > { %1023 = vmatprep.subr.mxu0 %v1238_v2 }
 0x12f   : > { %1024 = vmatpush3.msra.mxu0 %v430_v6 }
 0x130   : > { %1025 = vmatprep.subr.mxu0 %v1238_v2 }
 0x131   : > { %1026 = vmatpush3.msra.mxu0 %v429_v7 }
 0x132   : > { %1027 = vmatprep.subr.mxu0 %v1238_v2 }
 0x133   : > { %1028 = vmatpush3.msra.mxu0 %v428_v8 }
 0x1ec   : > { %v581_v20 = vpop.f32.mrf.mxu0 }
 0x1ed   : > { %v585_v21 = vadd.f32 %v581_v20, %v511_v19 }
 0x1ee   : > { %v1009_v22 = vpop.f32.mrf.mxu0 }
 0x1ef   : > { %1106 = vtanh.f32 %v585_v21 }
 0x1fc   : > { %v1107_v23 = vpop.eup %1106 }
 0x1fd   : > { %587 = vst.msk [vmem:[#allocation4 + $0x2] sm:$0x3] %vm509_vm4, %v1107_v23  ;;  %1019 = vmatmul.mubr.msk.f32.vlgmr.msra.gmra.mxu1 %vm426_vm3, %v1107_v23 }
 0x1fe   : > { %1040 = vmatprep.mubr.msk.f32.mxu1 %vm1239_vm1, %v1238_v2  ;;  %1033 = vmatpush3.msra.mxu1 %v747_v29 }
 0x1ff   : > { %1034 = vmatprep.subr.mxu1 %v1238_v2 }
 0x200   : > { %1035 = vmatpush3.msra.mxu1 %v746_v30 }
 0x201   : > { %1036 = vmatprep.subr.mxu1 %v1238_v2 }
 0x202   : > { %1037 = vmatpush3.msra.mxu1 %v745_v31 }
 0x203   : > { %1038 = vmatprep.subr.mxu1 %v1238_v2 }
 0x204   : > { %1039 = vmatpush3.msra.mxu1 %v744_v32 }
 0x2bd   : > { %v658_v25 = vpop.f32.mrf.mxu1 }
 0x2be   : > { %v662_v26 = vadd.f32 %v658_v25, %v588_v24 }
 0x2bf   : > { %v1020_v27 = vpop.f32.mrf.mxu1 }
 0x2c0   : > { %1108 = vtanh.f32 %v662_v26 }
 0x2cd   : > { %v1109_v28 = vpop.eup %1108 }
 0x2ce   : > { %664 = vst.msk [vmem:[#allocation4 + $0x4] sm:$0x3] %vm509_vm4, %v1109_v28  ;;  %1030 = vmatmul.mubr.msk.f32.vlgmr.msra.gmra.mxu0 %vm426_vm3, %v1109_v28 }
 0x38e   : > { %v735_v34 = vpop.f32.mrf.mxu0 }
 0x38f   : > { %v739_v35 = vadd.f32 %v735_v34, %v665_v33 }
 0x390   : > { %v1031_v36 = vpop.f32.mrf.mxu0 }
 0x391   : > { %1110 = vtanh.f32 %v739_v35 }
 0x39e   : > { %v1111_v37 = vpop.eup %1110 }
 0x39f   : > { %741 = vst.msk [vmem:[#allocation4 + $0x6] sm:$0x3] %vm509_vm4, %v1111_v37  ;;  %742 = vst.msk [vmem:[#allocation2] sm:$0x3] %vm509_vm4, %v1111_v37 }
 0x3a0   : > { %830 = vst.msk [vmem:[#allocation10] sm:$0x3] %vm509_vm4, %v1111_v37 }
 0x3a6   : > { %v743_v38 = vld [vmem:[#allocation4] sm:$0xff] }
 0x3a7   : > { %1041 = vmatmul.mubr.msk.f32.vlgmr.msra.gmra.mxu1 %vm426_vm3, %v743_v38 }
 0x3a8   : > { %1179 = shalt.err (!%p1176_p2)
}
 0x3a9   : > { %1050 = dma.vmem_to_hbm [thread:$0]  (%p1064_p0), %s846_s24, 32, %s1508_s8, [#allocation7]   ;;  %v947_v39 = vld [vmem:[%s1506_s6] ss:$0 sm:$0xff]  ;;  %vm828_vm5 = vcmask 64512  }
 0x467   : > { %v824_v40 = vpop.f32.mrf.mxu1 }
 0x468   : > { %v825_v41 = vadd.f32 %v947_v39, %v824_v40 }
 0x469   : > { %v1042_v42 = vpop.f32.mrf.mxu1 }
 0x46a   : > { %829 = vst.msk [vmem:[%s1391_s16] sm:$0xff] %vm828_vm5, %v825_v41 }
 0x46b   : > { %1215 = dma.done.wait (%p1064_p0), [#allocation7], 32  }
 0x46c   : > { %1217 = vsyncadd (%p1064_p0), [#allocation7], 4294967264 }
 0x46d PF: > { %p21_p3 = scmp.ge.s32.totalorder %s1331_s15, 4   ;;  %s1521_s27 = smov %s1224_s28 }
 0x46e   : > { %s1522_s28 = smov %s1228_s29  ;;  %s1523_s29 = smov %s1348_s23 }
 0x46f   : > { %s1524_s30 = smov %s1331_s15  ;;  %23 = sbr.rel (!%p21_p3) target bundleno = 5 (0x5), region = 105 }
 0x474   :  { %865 = vsyncpa [#allocation6], 1 }
 0x475   :  { %867 = vsyncpa [#allocation6 + $0x1], 1 }
 0x476   :  { %868 = vsyncpa [#allocation9], 1 }
 0x477   :  { %869 = vsyncpa [#allocation7], 1 }
 0x478   :  { %871 = vsyncpa [#allocation7 + $0x1], 1 }

</bundles_post_ra>
